<compile_context>
chip_gen: v6e
topology: v6e:2x2x1
jax: 0.10.0
libtpu: 0.0.40
codegen_flags: <defaults>
</compile_context>

<pallas_src>
import functools

import jax
import jax.numpy as jnp
from jax.experimental import pallas as pl
from jax.experimental.pallas import tpu as pltpu


_WIDTHS = (8192, 4096, 2048, 1024, 512, 256, 128)  # lane-dense candidate widths
_PAD_WIDTH = 128                                    # ragged path: minimal padding
_SMALL_INPUT_BYTES = 1 << 20                        # below this, fused XLA exp wins
_MEGACORE_MIN_BYTES = 2 << 20                       # above this, force >=2 grid steps


@functools.lru_cache(maxsize=1)
def _gen_params():
    """(target_block_bytes, vmem_limit_bytes) tuned per TPU generation."""
    try:
        kind = jax.devices()[0].device_kind.lower()
    except Exception:  # pragma: no cover - defensive; assume older gen
        kind = ""
    if "v7" in kind:
        # 3.2 TB/s per TC -> larger blocks to amortize the ~0.35 us per-step
        # overhead; 2*(8+8) MiB double-buffered stays well under 64 MiB VMEM.
        return 8 * 1024 * 1024, 48 * 1024 * 1024
    # v5e / v6e plateau at the HBM roofline with ~4 MiB blocks.
    return 4 * 1024 * 1024, 32 * 1024 * 1024


def _exp_kernel(x_ref, o_ref):
    # Elementwise exp on the whole VMEM tile. Upcast sub-f32 dtypes so the EUP
    # transcendental runs in f32 (parity with torch; the extra VPU casts hide
    # in DMA slack since this kernel is HBM-bound).
    x = x_ref[...]
    o_ref[...] = jnp.exp(x.astype(jnp.float32)).astype(o_ref.dtype)


def _exp_impl(x, force_pallas=False):
    if not jnp.issubdtype(x.dtype, jnp.floating):
        # torch.exp rejects integer tensors; mirror that.
        raise TypeError(f"exp_activation: expected floating dtype, got {x.dtype}")

    orig_shape = x.shape
    n = x.size
    if n == 0:
        return x

    itemsize = jnp.dtype(x.dtype).itemsize
    total_bytes = n * itemsize

    # Tiny activations: pallas_call launch + single-step pipeline overhead
    # dominates; a fused XLA elementwise exp is as fast or faster.
    if not force_pallas and total_bytes < _SMALL_INPUT_BYTES:
        return jnp.exp(x)

    target_block_bytes, vmem_limit = _gen_params()

    flat = x.reshape(-1)  # contiguous -> free

    # Widest lane-dense width dividing n -> zero padding, zero tail slice.
    width = next((w for w in _WIDTHS if n % w == 0), 0)
    padded_n = n
    if width == 0:
        # Ragged size: pad minimally to a multiple of 128. With
        # allow_input_fusion the pad/reshape fuses into the pallas_call input.
        width = _PAD_WIDTH
        padded_n = pl.cdiv(n, width) * width
        flat = jnp.pad(flat, (0, padded_n - n))

    rows = padded_n // width

    # Sublane packing for the dtype: 8 rows (f32), 16 (bf16/f16), 32 (fp8/int8).
    pack = max(1, 4 // itemsize) * 8

    # Row tile sized for ~target_block_bytes per block, pack-aligned.
    r_block = max(pack, (target_block_bytes // (width * itemsize)) // pack * pack)
    r_block = min(r_block, rows)

    # Ensure >=2 grid steps for reasonably sized slabs so ("parallel",) can
    # shard across both v7x TensorCores (no effect on single-TC v5e/v6e).
    if (total_bytes >= _MEGACORE_MIN_BYTES
            and rows >= 2 * pack
            and pl.cdiv(rows, r_block) < 2):
        r_block = max(pack, (rows // 2) // pack * pack)

    grid = (pl.cdiv(rows, r_block),)
    slab = flat.reshape(rows, width)

    out = pl.pallas_call(
        _exp_kernel,
        out_shape=jax.ShapeDtypeStruct((rows, width), x.dtype),
        grid=grid,
        in_specs=[pl.BlockSpec((r_block, width), lambda i: (i, 0))],
        out_specs=pl.BlockSpec((r_block, width), lambda i: (i, 0)),
        compiler_params=pltpu.CompilerParams(
            dimension_semantics=("parallel",),
            vmem_limit_bytes=vmem_limit,
            allow_input_fusion=[True],
        ),
        cost_estimate=pl.CostEstimate(
            flops=0,
            transcendentals=padded_n,
            bytes_accessed=2 * padded_n * itemsize,
        ),
    )(slab)

    out_flat = out.reshape(-1)       # contiguous -> free
    if padded_n != n:
        out_flat = out_flat[:n]      # single slice (fuses with the reshape under jit)
    return out_flat.reshape(orig_shape)


# jit so pad / slice / reshape plumbing fuses around the pallas_call.
exp_activation = jax.jit(_exp_impl, static_argnames=("force_pallas",))


if __name__ == "__main__":
    key = jax.random.PRNGKey(0)
    k1, k2, k3 = jax.random.split(key, 3)

    # 1) Small NCHW activation (module-typical shape); force the Pallas path.
    x = jax.random.normal(key, (2, 4, 16, 16), dtype=jnp.float32)
    y = jax.block_until_ready(exp_activation(x, force_pallas=True))
    assert y.shape == x.shape and y.dtype == x.dtype
    assert jnp.allclose(y, jnp.exp(x), rtol=1e-6, atol=1e-6)

    # 2) Same small input through the default path (small-input fallback).
    y_fb = jax.block_until_ready(exp_activation(x))
    assert jnp.allclose(y_fb, jnp.exp(x), rtol=1e-6, atol=1e-6)

    # 3) Ragged size (not a multiple of 128) -> minimal-pad path.
    x2 = jax.random.normal(k1, (3, 5, 7, 11), dtype=jnp.float32)
    y2 = jax.block_until_ready(exp_activation(x2, force_pallas=True))
    assert y2.shape == x2.shape
    assert jnp.allclose(y2, jnp.exp(x2), rtol=1e-6, atol=1e-6)

    # 4) bf16 input (f32 upcast inside the kernel).
    x3 = jax.random.normal(k2, (4, 8, 16, 16), dtype=jnp.bfloat16)
    y3 = jax.block_until_ready(exp_activation(x3, force_pallas=True))
    assert y3.dtype == jnp.bfloat16
    assert jnp.allclose(y3.astype(jnp.float32),
                        jnp.exp(x3.astype(jnp.float32)),
                        rtol=2e-2, atol=2e-2)

    # 5) Medium tensor (2 MiB) -> default Pallas path, >=2 grid steps.
    x4 = jax.random.normal(k3, (4, 32, 64, 64), dtype=jnp.float32)
    y4 = jax.block_until_ready(exp_activation(x4))
    assert jnp.allclose(y4, jnp.exp(x4), rtol=1e-6, atol=1e-6)

    print("KERNEL_OK")
</pallas_src>

<mosaic_0001>
module attributes {stable_mosaic.version = 11 : i64} {
  func.func @_exp_kernel(%arg0: i32, %arg1: memref<1x2048xf32, #tpu.memory_space<vmem>>, %arg2: memref<1x2048xf32, #tpu.memory_space<vmem>>) attributes {dimension_semantics = [#tpu.dimension_semantics<parallel>], iteration_bounds = array<i64: 1>, scalar_prefetch = 0 : i64, scratch_operands = 0 : i64, tpu.core_type = #tpu.core_type<tc>, window_params = [{transform_indices = @transform_0, window_bounds = array<i64: 1, 2048>}, {transform_indices = @transform_1, window_bounds = array<i64: 1, 2048>}]} {
    %c0 = arith.constant 0 : index
    %c0_0 = arith.constant 0 : index
    %0 = vector.load %arg1[%c0, %c0_0] : memref<1x2048xf32, #tpu.memory_space<vmem>>, vector<1x2048xf32>
    %1 = math.exp %0 : vector<1x2048xf32>
    %c0_1 = arith.constant 0 : index
    %c0_2 = arith.constant 0 : index
    %2 = vector.load %arg2[%c0_1, %c0_2] : memref<1x2048xf32, #tpu.memory_space<vmem>>, vector<1x2048xf32>
    tpu.vector_store %arg2[%c0_1, %c0_2], %1 {strides = array<i32>} : memref<1x2048xf32, #tpu.memory_space<vmem>>, vector<1x2048xf32>,
    return
  }
  func.func @transform_0(%arg0: i32) -> (i32, i32) {
    %c0_i32 = arith.constant 0 : i32
    %c0_i32_0 = arith.constant 0 : i32
    return %arg0, %c0_i32 : i32, i32
  }
  func.func @transform_1(%arg0: i32) -> (i32, i32) {
    %c0_i32 = arith.constant 0 : i32
    %c0_i32_0 = arith.constant 0 : i32
    return %arg0, %c0_i32 : i32, i32
  }
}

</mosaic_0001>

<bundles_post_ra>
// kernel: _exp_impl.1
= control target key start
LH: loop header
LB: loop body
LE: loop exit
PB: predicated region body
PF: predicated region fallthrough
CT: control target
= control target key end

     0   :  { %s46_s0 = inlined_call_operand.vmem [shape: f32[1,2048], index: 0, kind: input, shape index: {}]   ;;  %s47_s1 = inlined_call_operand.vmem [shape: f32[1,2048], index: 1, kind: output, shape index: {}]  }
   0x1   :  { %v8_v0 = vld [vmem:[%s46_s0] sm:$0xff]  ;;  %v9_v1 = vld [vmem:[%s46_s0 + $0x8] sm:$0xff] }
   0x2   :  { %v10_v2 = vmul.f32 1.442695, %v8_v0  ;;  %v12_v3 = vmul.f32 1.442695, %v9_v1 }
   0x4   :  { %20 = vpow2.f32 %v10_v2 }
   0x5   :  { %22 = vpow2.f32 %v12_v3 }
  0x11   :  { %v21_v4 = vpop.eup %20 }
  0x12   :  { %v23_v5 = vpop.eup %22  ;;  %14 = vst [vmem:[%s47_s1] sm:$0xff] %v21_v4 }
  0x13   :  { %15 = vst [vmem:[%s47_s1 + $0x8] sm:$0xff] %v23_v5 }

</bundles_post_ra>
